<compile_context>
chip_gen: v7x
topology: tpu7x:2x2x1
jax: 0.10.0
libtpu: 0.0.40
codegen_flags: <defaults>
</compile_context>

<pallas_src>
import functools

import jax
import jax.numpy as jnp
import numpy as np
from jax.experimental import pallas as pl
from jax.experimental.pallas import tpu as pltpu

EPS = 1e-5


def _basic_block_kernel(x_ref, w1_ref, g1_ref, be1_ref,
                        w2_ref, g2_ref, be2_ref,
                        o_ref, pad_ref, *, channels, inv_count, compute_dtype):
    f32 = jnp.float32
    N, Hp2, WC = pad_ref.shape
    H = Hp2 - 2
    P = N * H
    W = WC // channels

    def fold_w(t):
        # t: (1, W*C).  Per-channel totals broadcast back over the W groups:
        #   out[:, w*C+c] = sum_{w'} t[:, w'*C+c]
        # via circular lane rotations (XLU slot, exact f32 adds).
        if W & (W - 1) == 0:                      # log2(W) doubling chain
            shift = channels
            r = t
            while shift < WC:
                r = r + pltpu.roll(r, shift, axis=1)
                shift *= 2
            return r
        acc = t                                    # generic fallback
        for k in range(1, W):
            acc = acc + pltpu.roll(t, k * channels, axis=1)
        return acc

    def conv3x3(w_ref):
        # Three kh row-windows (full-lane reads of the H-padded scratch),
        # concatenated at 128-aligned lane offsets, then ONE MXU matmul
        # against the block-banded row weight.  Output is already in the
        # lane-dense (P, W*C) row layout -- no per-pixel repacking.
        wins = [pad_ref[:, kh:kh + H, :].reshape(P, WC) for kh in range(3)]
        patches = jnp.concatenate(wins, axis=-1)                 # (P, 3*W*C)
        return jnp.dot(patches.astype(compute_dtype), w_ref[...],
                       preferred_element_type=f32)               # (P, W*C) f32

    def bn_train(y, g_ref, be_ref):
        # One-pass batch-stats BN folded into a per-lane scale/bias (all f32).
        s = fold_w(jnp.sum(y, axis=0, keepdims=True))            # (1, W*C)
        ss = fold_w(jnp.sum(y * y, axis=0, keepdims=True))       # (1, W*C)
        mean = s * inv_count
        var = jnp.maximum(ss * inv_count - mean * mean, 0.0)     # clamp >= 0
        scale = g_ref[...] * jax.lax.rsqrt(var + EPS)            # EUP
        bias = be_ref[...] - mean * scale
        return y * scale + bias

    # Zero only the top/bottom halo rows, once (full-lane row stores).  The
    # interior is fully overwritten before each conv; there is no W halo.
    zrow = jnp.zeros((N, 1, WC), f32)
    pad_ref[:, 0:1, :] = zrow
    pad_ref[:, H + 1:H + 2, :] = zrow

    # --- conv1 -> bn1 -> relu ---   (conv bias cancelled by batch-stats BN)
    pad_ref[:, 1:H + 1, :] = x_ref[...].astype(f32)
    h = jnp.maximum(bn_train(conv3x3(w1_ref), g1_ref, be1_ref), 0.0)

    # --- conv2 -> bn2 ---
    pad_ref[:, 1:H + 1, :] = h.reshape(N, H, WC)
    y = bn_train(conv3x3(w2_ref), g2_ref, be2_ref)

    # --- residual add + relu; lane-dense (N, H, W*C) store ---
    out = x_ref[...].astype(f32) + y.reshape(N, H, WC)           # reload x here
    o_ref[...] = jnp.maximum(out, 0.0).astype(o_ref.dtype)


def _conv_weight_rowmat(w, width):
    """HWIO (3,3,Cin,Cout) -> block-banded (3*W*Cin, W*Cout) row-matmul weight.

    Wrow[(kh*W + wi)*Cin + ci, wo*Cout + co] = w[kh, wi-wo+1, ci, co] when
    |wi - wo| <= 1, else 0.  Multiplying an H-padded, lane-dense image-row
    block (N*H, 3*W*Cin) by this matrix is exactly the 3x3 'SAME' conv with
    stride 1; the zero band realizes the W-direction zero padding.
    """
    kh_, kw_, ci, co = w.shape
    assert (kh_, kw_) == (3, 3)
    wi = np.arange(width)[:, None]
    wo = np.arange(width)[None, :]
    kw = wi - wo + 1
    valid = (kw >= 0) & (kw < 3)
    kw_c = np.clip(kw, 0, 2)
    big = w[:, kw_c]                                            # (3, W, W, ci, co)
    big = big * jnp.asarray(valid, dtype=w.dtype)[None, :, :, None, None]
    big = jnp.transpose(big, (0, 1, 3, 2, 4))                   # (3, W, ci, W, co)
    return big.reshape(3 * width * ci, width * co)


def basic_block(x, w1, b1, g1, be1, w2, b2, g2, be2, *,
                compute_dtype=jnp.float32):
    """x: (N,H,W,C) NHWC; w*: (3,3,Cin,Cout) HWIO; b*/g*/be*: (C,).

    stride=1 and in_channels == out_channels (required by the residual add).
    Conv biases are mathematically cancelled by training-mode BN -> unused.
    """
    N, H, W, C = x.shape
    del b1, b2
    WC = W * C

    # Lane-dense I/O layout: last dim = W*C (exactly 128 for the demo shape).
    x2 = x.reshape(N, H, WC)
    wr1 = _conv_weight_rowmat(w1, W).astype(compute_dtype)      # pre-cast weights
    wr2 = _conv_weight_rowmat(w2, W).astype(compute_dtype)
    # BN affine params pre-tiled over W so they apply per-lane in the kernel.
    g1t, be1t = jnp.tile(g1, W).reshape(1, WC), jnp.tile(be1, W).reshape(1, WC)
    g2t, be2t = jnp.tile(g2, W).reshape(1, WC), jnp.tile(be2, W).reshape(1, WC)

    args = (x2, wr1, g1t, be1t, wr2, g2t, be2t)

    def full(a):
        nd = a.ndim
        return pl.BlockSpec(a.shape, lambda i, nd=nd: (0,) * nd)

    # VMEM budget from actual buffer sizes (+ headroom for compiler temps);
    # Pallas double-buffers each input/output block even at grid=(1,).
    in_bytes = sum(int(a.size) * a.dtype.itemsize for a in args)
    out_bytes = int(x2.size) * x2.dtype.itemsize
    scratch_bytes = N * (H + 2) * WC * 4
    vmem_limit = 2 * (in_bytes + out_bytes) + scratch_bytes + (4 << 20)

    flops = 2 * (2 * (N * H) * (3 * WC) * WC)                   # two row-matmul convs
    bytes_accessed = in_bytes + out_bytes

    kernel = functools.partial(_basic_block_kernel, channels=C,
                               inv_count=1.0 / (N * H * W),
                               compute_dtype=compute_dtype)

    out = pl.pallas_call(
        kernel,
        out_shape=jax.ShapeDtypeStruct((N, H, WC), x.dtype),
        grid_spec=pltpu.PrefetchScalarGridSpec(
            num_scalar_prefetch=0,
            grid=(1,),
            in_specs=[full(a) for a in args],
            out_specs=pl.BlockSpec((N, H, WC), lambda i: (0, 0, 0)),
            scratch_shapes=[pltpu.VMEM((N, H + 2, WC), jnp.float32)],
        ),
        compiler_params=pltpu.CompilerParams(
            dimension_semantics=("arbitrary",),
            vmem_limit_bytes=int(vmem_limit)),
        cost_estimate=pl.CostEstimate(flops=int(flops), transcendentals=2 * WC,
                                      bytes_accessed=int(bytes_accessed)),
    )(*args)
    return out.reshape(N, H, W, C)


# ---------------- pure-JAX reference (for verification) ----------------
def _ref_conv3x3(x, w, b):
    y = jax.lax.conv_general_dilated(
        x, w, window_strides=(1, 1), padding="SAME",
        dimension_numbers=("NHWC", "HWIO", "NHWC"))
    return y + b.reshape(1, 1, 1, -1)


def _ref_bn(y, g, be):
    m = y.mean(axis=(0, 1, 2), keepdims=True)
    v = ((y - m) ** 2).mean(axis=(0, 1, 2), keepdims=True)
    return (y - m) / jnp.sqrt(v + EPS) * g.reshape(1, 1, 1, -1) + be.reshape(1, 1, 1, -1)


def _ref_basic_block(x, w1, b1, g1, be1, w2, b2, g2, be2):
    h = jnp.maximum(_ref_bn(_ref_conv3x3(x, w1, b1), g1, be1), 0.0)
    y = _ref_bn(_ref_conv3x3(h, w2, b2), g2, be2)
    return jnp.maximum(x + y, 0.0)


if __name__ == "__main__":
    # Small shapes: batch=2, channels=8, spatial=16x16, stride=1
    # (stride must be 1 and in_channels == out_channels for the residual add;
    #  W*C = 128 makes every row exactly one full lane-tile).
    N, H, W, C = 2, 16, 16, 8
    key = jax.random.PRNGKey(0)
    ks = jax.random.split(key, 9)

    x = jax.random.normal(ks[0], (N, H, W, C), jnp.float32)          # NHWC
    w1 = jax.random.normal(ks[1], (3, 3, C, C), jnp.float32) * 0.1   # HWIO
    b1 = jax.random.normal(ks[2], (C,), jnp.float32) * 0.1
    g1 = 1.0 + 0.1 * jax.random.normal(ks[3], (C,), jnp.float32)
    be1 = 0.1 * jax.random.normal(ks[4], (C,), jnp.float32)
    w2 = jax.random.normal(ks[5], (3, 3, C, C), jnp.float32) * 0.1
    b2 = jax.random.normal(ks[6], (C,), jnp.float32) * 0.1
    g2 = 1.0 + 0.1 * jax.random.normal(ks[7], (C,), jnp.float32)
    be2 = 0.1 * jax.random.normal(ks[8], (C,), jnp.float32)

    ref = _ref_basic_block(x, w1, b1, g1, be1, w2, b2, g2, be2)

    # f32 matmul path: tight check against the reference (which includes the
    # conv biases -- they cancel under training-mode BN, as exploited in-kernel).
    out = basic_block(x, w1, b1, g1, be1, w2, b2, g2, be2,
                      compute_dtype=jnp.float32)
    out = jax.block_until_ready(out)
    assert out.shape == (N, H, W, C)
    assert jnp.allclose(out, ref, rtol=5e-4, atol=5e-4), \
        f"f32 max abs err = {jnp.max(jnp.abs(out - ref))}"

    # bf16 matmul-operand path (recommended on v6e/v7x MXU); f32 accumulation,
    # f32 BN stats -- checked with a bf16-appropriate tolerance.
    out_bf16 = basic_block(x, w1, b1, g1, be1, w2, b2, g2, be2,
                           compute_dtype=jnp.bfloat16)
    out_bf16 = jax.block_until_ready(out_bf16)
    assert jnp.allclose(out_bf16, ref, rtol=5e-2, atol=5e-2), \
        f"bf16 max abs err = {jnp.max(jnp.abs(out_bf16 - ref))}"

    print("KERNEL_OK")
</pallas_src>

<mosaic_0001>
module attributes {stable_mosaic.version = 11 : i64} {
  func.func @_basic_block_kernel(%arg0: i32, %arg1: memref<2x16x128xf32, #tpu.memory_space<vmem>>, %arg2: memref<384x128xf32, #tpu.memory_space<vmem>>, %arg3: memref<1x128xf32, #tpu.memory_space<vmem>>, %arg4: memref<1x128xf32, #tpu.memory_space<vmem>>, %arg5: memref<384x128xf32, #tpu.memory_space<vmem>>, %arg6: memref<1x128xf32, #tpu.memory_space<vmem>>, %arg7: memref<1x128xf32, #tpu.memory_space<vmem>>, %arg8: memref<2x16x128xf32, #tpu.memory_space<vmem>>, %arg9: memref<2x18x128xf32, #tpu.memory_space<vmem>>) attributes {dimension_semantics = [#tpu.dimension_semantics<arbitrary>], iteration_bounds = array<i64: 1>, scalar_prefetch = 0 : i64, scratch_operands = 1 : i64, tpu.core_type = #tpu.core_type<tc>, window_params = [{pipeline_mode = #tpu.pipeline_mode<synchronous>, transform_indices = @transform_0, window_bounds = array<i64: 2, 16, 128>}, {pipeline_mode = #tpu.pipeline_mode<synchronous>, transform_indices = @transform_1, window_bounds = array<i64: 384, 128>}, {pipeline_mode = #tpu.pipeline_mode<synchronous>, transform_indices = @transform_2, window_bounds = array<i64: 1, 128>}, {pipeline_mode = #tpu.pipeline_mode<synchronous>, transform_indices = @transform_3, window_bounds = array<i64: 1, 128>}, {pipeline_mode = #tpu.pipeline_mode<synchronous>, transform_indices = @transform_4, window_bounds = array<i64: 384, 128>}, {pipeline_mode = #tpu.pipeline_mode<synchronous>, transform_indices = @transform_5, window_bounds = array<i64: 1, 128>}, {pipeline_mode = #tpu.pipeline_mode<synchronous>, transform_indices = @transform_6, window_bounds = array<i64: 1, 128>}, {pipeline_mode = #tpu.pipeline_mode<synchronous>, transform_indices = @transform_7, window_bounds = array<i64: 2, 16, 128>}]} {
    %cst = arith.constant 0.000000e+00 : f32
    %0 = vector.broadcast %cst : f32 to vector<2x1x128xf32>
    %c0 = arith.constant 0 : index
    %c0_0 = arith.constant 0 : index
    %c0_1 = arith.constant 0 : index
    %1 = vector.load %arg9[%c0, %c0_0, %c0_1] : memref<2x18x128xf32, #tpu.memory_space<vmem>>, vector<2x1x128xf32>
    tpu.vector_store %arg9[%c0, %c0_0, %c0_1], %0 {strides = array<i32>} : memref<2x18x128xf32, #tpu.memory_space<vmem>>, vector<2x1x128xf32>,
    %c0_2 = arith.constant 0 : index
    %c17 = arith.constant 17 : index
    %c0_3 = arith.constant 0 : index
    %2 = vector.load %arg9[%c0_2, %c17, %c0_3] : memref<2x18x128xf32, #tpu.memory_space<vmem>>, vector<2x1x128xf32>
    tpu.vector_store %arg9[%c0_2, %c17, %c0_3], %0 {strides = array<i32>} : memref<2x18x128xf32, #tpu.memory_space<vmem>>, vector<2x1x128xf32>,
    %c0_4 = arith.constant 0 : index
    %c0_5 = arith.constant 0 : index
    %c0_6 = arith.constant 0 : index
    %3 = vector.load %arg1[%c0_4, %c0_5, %c0_6] : memref<2x16x128xf32, #tpu.memory_space<vmem>>, vector<2x16x128xf32>
    %c0_7 = arith.constant 0 : index
    %c1 = arith.constant 1 : index
    %c0_8 = arith.constant 0 : index
    %4 = vector.load %arg9[%c0_7, %c1, %c0_8] : memref<2x18x128xf32, #tpu.memory_space<vmem>>, vector<2x16x128xf32>
    tpu.vector_store %arg9[%c0_7, %c1, %c0_8], %3 {strides = array<i32>} : memref<2x18x128xf32, #tpu.memory_space<vmem>>, vector<2x16x128xf32>,
    %c0_9 = arith.constant 0 : index
    %c0_10 = arith.constant 0 : index
    %c0_11 = arith.constant 0 : index
    %5 = vector.load %arg9[%c0_9, %c0_10, %c0_11] : memref<2x18x128xf32, #tpu.memory_space<vmem>>, vector<2x16x128xf32>
    %6 = vector.shape_cast %5 : vector<2x16x128xf32> to vector<32x128xf32>
    %c0_12 = arith.constant 0 : index
    %c1_13 = arith.constant 1 : index
    %c0_14 = arith.constant 0 : index
    %7 = vector.load %arg9[%c0_12, %c1_13, %c0_14] : memref<2x18x128xf32, #tpu.memory_space<vmem>>, vector<2x16x128xf32>
    %8 = vector.shape_cast %7 : vector<2x16x128xf32> to vector<32x128xf32>
    %c0_15 = arith.constant 0 : index
    %c2 = arith.constant 2 : index
    %c0_16 = arith.constant 0 : index
    %9 = vector.load %arg9[%c0_15, %c2, %c0_16] : memref<2x18x128xf32, #tpu.memory_space<vmem>>, vector<2x16x128xf32>
    %10 = vector.shape_cast %9 : vector<2x16x128xf32> to vector<32x128xf32>
    %11 = tpu.concatenate %6, %8, %10 in 1 : vector<32x128xf32>, vector<32x128xf32>, vector<32x128xf32> -> vector<32x384xf32>
    %c0_17 = arith.constant 0 : index
    %c0_18 = arith.constant 0 : index
    %12 = vector.load %arg2[%c0_17, %c0_18] : memref<384x128xf32, #tpu.memory_space<vmem>>, vector<384x128xf32>
    %cst_19 = arith.constant dense<0.000000e+00> : vector<32x128xf32>
    %13 = tpu.matmul %11, %12, %cst_19 {dimension_numbers = #tpu.dot_dimension_numbers<[1], [0], [0], [1], [0, 0, 1, 1], [], []>} : vector<32x384xf32>, vector<384x128xf32>, vector<32x128xf32> -> vector<32x128xf32>
    %cst_20 = arith.constant dense<0.000000e+00> : vector<128xf32>
    %14 = vector.multi_reduction <add>, %13, %cst_20 [0] : vector<32x128xf32> to vector<128xf32>
    %15 = vector.shape_cast %14 : vector<128xf32> to vector<1x128xf32>
    %c8_i32 = arith.constant 8 : i32
    %16 = tpu.dynamic_rotate %15 by %c8_i32 dim 1 : vector<1x128xf32>, i32 -> vector<1x128xf32>
    %17 = arith.addf %15, %16 : vector<1x128xf32>
    %c16_i32 = arith.constant 16 : i32
    %18 = tpu.dynamic_rotate %17 by %c16_i32 dim 1 : vector<1x128xf32>, i32 -> vector<1x128xf32>
    %19 = arith.addf %17, %18 : vector<1x128xf32>
    %c32_i32 = arith.constant 32 : i32
    %20 = tpu.dynamic_rotate %19 by %c32_i32 dim 1 : vector<1x128xf32>, i32 -> vector<1x128xf32>
    %21 = arith.addf %19, %20 : vector<1x128xf32>
    %c64_i32 = arith.constant 64 : i32
    %22 = tpu.dynamic_rotate %21 by %c64_i32 dim 1 : vector<1x128xf32>, i32 -> vector<1x128xf32>
    %23 = arith.addf %21, %22 : vector<1x128xf32>
    %24 = arith.mulf %13, %13 : vector<32x128xf32>
    %cst_21 = arith.constant dense<0.000000e+00> : vector<128xf32>
    %25 = vector.multi_reduction <add>, %24, %cst_21 [0] : vector<32x128xf32> to vector<128xf32>
    %26 = vector.shape_cast %25 : vector<128xf32> to vector<1x128xf32>
    %c8_i32_22 = arith.constant 8 : i32
    %27 = tpu.dynamic_rotate %26 by %c8_i32_22 dim 1 : vector<1x128xf32>, i32 -> vector<1x128xf32>
    %28 = arith.addf %26, %27 : vector<1x128xf32>
    %c16_i32_23 = arith.constant 16 : i32
    %29 = tpu.dynamic_rotate %28 by %c16_i32_23 dim 1 : vector<1x128xf32>, i32 -> vector<1x128xf32>
    %30 = arith.addf %28, %29 : vector<1x128xf32>
    %c32_i32_24 = arith.constant 32 : i32
    %31 = tpu.dynamic_rotate %30 by %c32_i32_24 dim 1 : vector<1x128xf32>, i32 -> vector<1x128xf32>
    %32 = arith.addf %30, %31 : vector<1x128xf32>
    %c64_i32_25 = arith.constant 64 : i32
    %33 = tpu.dynamic_rotate %32 by %c64_i32_25 dim 1 : vector<1x128xf32>, i32 -> vector<1x128xf32>
    %34 = arith.addf %32, %33 : vector<1x128xf32>
    %cst_26 = arith.constant 0.001953125 : f32
    %35 = vector.broadcast %cst_26 : f32 to vector<1x128xf32>
    %36 = arith.mulf %23, %35 : vector<1x128xf32>
    %cst_27 = arith.constant 0.001953125 : f32
    %37 = vector.broadcast %cst_27 : f32 to vector<1x128xf32>
    %38 = arith.mulf %34, %37 : vector<1x128xf32>
    %39 = arith.mulf %36, %36 : vector<1x128xf32>
    %40 = arith.subf %38, %39 : vector<1x128xf32>
    %cst_28 = arith.constant 0.000000e+00 : f32
    %41 = vector.broadcast %cst_28 : f32 to vector<1x128xf32>
    %42 = arith.maximumf %40, %41 : vector<1x128xf32>
    %c0_29 = arith.constant 0 : index
    %c0_30 = arith.constant 0 : index
    %43 = vector.load %arg3[%c0_29, %c0_30] : memref<1x128xf32, #tpu.memory_space<vmem>>, vector<1x128xf32>
    %cst_31 = arith.constant 9.99999974E-6 : f32
    %44 = vector.broadcast %cst_31 : f32 to vector<1x128xf32>
    %45 = arith.addf %42, %44 : vector<1x128xf32>
    %46 = math.rsqrt %45 : vector<1x128xf32>
    %47 = arith.mulf %43, %46 : vector<1x128xf32>
    %c0_32 = arith.constant 0 : index
    %c0_33 = arith.constant 0 : index
    %48 = vector.load %arg4[%c0_32, %c0_33] : memref<1x128xf32, #tpu.memory_space<vmem>>, vector<1x128xf32>
    %49 = arith.mulf %36, %47 : vector<1x128xf32>
    %50 = arith.subf %48, %49 : vector<1x128xf32>
    %51 = vector.broadcast %47 : vector<1x128xf32> to vector<32x128xf32>
    %52 = arith.mulf %13, %51 : vector<32x128xf32>
    %53 = vector.broadcast %50 : vector<1x128xf32> to vector<32x128xf32>
    %54 = arith.addf %52, %53 : vector<32x128xf32>
    %cst_34 = arith.constant 0.000000e+00 : f32
    %55 = vector.broadcast %cst_34 : f32 to vector<32x128xf32>
    %56 = arith.maximumf %54, %55 : vector<32x128xf32>
    %57 = vector.shape_cast %56 : vector<32x128xf32> to vector<2x16x128xf32>
    %c0_35 = arith.constant 0 : index
    %c1_36 = arith.constant 1 : index
    %c0_37 = arith.constant 0 : index
    %58 = vector.load %arg9[%c0_35, %c1_36, %c0_37] : memref<2x18x128xf32, #tpu.memory_space<vmem>>, vector<2x16x128xf32>
    tpu.vector_store %arg9[%c0_35, %c1_36, %c0_37], %57 {strides = array<i32>} : memref<2x18x128xf32, #tpu.memory_space<vmem>>, vector<2x16x128xf32>,
    %c0_38 = arith.constant 0 : index
    %c0_39 = arith.constant 0 : index
    %c0_40 = arith.constant 0 : index
    %59 = vector.load %arg9[%c0_38, %c0_39, %c0_40] : memref<2x18x128xf32, #tpu.memory_space<vmem>>, vector<2x16x128xf32>
    %60 = vector.shape_cast %59 : vector<2x16x128xf32> to vector<32x128xf32>
    %c0_41 = arith.constant 0 : index
    %c1_42 = arith.constant 1 : index
    %c0_43 = arith.constant 0 : index
    %61 = vector.load %arg9[%c0_41, %c1_42, %c0_43] : memref<2x18x128xf32, #tpu.memory_space<vmem>>, vector<2x16x128xf32>
    %62 = vector.shape_cast %61 : vector<2x16x128xf32> to vector<32x128xf32>
    %c0_44 = arith.constant 0 : index
    %c2_45 = arith.constant 2 : index
    %c0_46 = arith.constant 0 : index
    %63 = vector.load %arg9[%c0_44, %c2_45, %c0_46] : memref<2x18x128xf32, #tpu.memory_space<vmem>>, vector<2x16x128xf32>
    %64 = vector.shape_cast %63 : vector<2x16x128xf32> to vector<32x128xf32>
    %65 = tpu.concatenate %60, %62, %64 in 1 : vector<32x128xf32>, vector<32x128xf32>, vector<32x128xf32> -> vector<32x384xf32>
    %c0_47 = arith.constant 0 : index
    %c0_48 = arith.constant 0 : index
    %66 = vector.load %arg5[%c0_47, %c0_48] : memref<384x128xf32, #tpu.memory_space<vmem>>, vector<384x128xf32>
    %cst_49 = arith.constant dense<0.000000e+00> : vector<32x128xf32>
    %67 = tpu.matmul %65, %66, %cst_49 {dimension_numbers = #tpu.dot_dimension_numbers<[1], [0], [0], [1], [0, 0, 1, 1], [], []>} : vector<32x384xf32>, vector<384x128xf32>, vector<32x128xf32> -> vector<32x128xf32>
    %cst_50 = arith.constant dense<0.000000e+00> : vector<128xf32>
    %68 = vector.multi_reduction <add>, %67, %cst_50 [0] : vector<32x128xf32> to vector<128xf32>
    %69 = vector.shape_cast %68 : vector<128xf32> to vector<1x128xf32>
    %c8_i32_51 = arith.constant 8 : i32
    %70 = tpu.dynamic_rotate %69 by %c8_i32_51 dim 1 : vector<1x128xf32>, i32 -> vector<1x128xf32>
    %71 = arith.addf %69, %70 : vector<1x128xf32>
    %c16_i32_52 = arith.constant 16 : i32
    %72 = tpu.dynamic_rotate %71 by %c16_i32_52 dim 1 : vector<1x128xf32>, i32 -> vector<1x128xf32>
    %73 = arith.addf %71, %72 : vector<1x128xf32>
    %c32_i32_53 = arith.constant 32 : i32
    %74 = tpu.dynamic_rotate %73 by %c32_i32_53 dim 1 : vector<1x128xf32>, i32 -> vector<1x128xf32>
    %75 = arith.addf %73, %74 : vector<1x128xf32>
    %c64_i32_54 = arith.constant 64 : i32
    %76 = tpu.dynamic_rotate %75 by %c64_i32_54 dim 1 : vector<1x128xf32>, i32 -> vector<1x128xf32>
    %77 = arith.addf %75, %76 : vector<1x128xf32>
    %78 = arith.mulf %67, %67 : vector<32x128xf32>
    %cst_55 = arith.constant dense<0.000000e+00> : vector<128xf32>
    %79 = vector.multi_reduction <add>, %78, %cst_55 [0] : vector<32x128xf32> to vector<128xf32>
    %80 = vector.shape_cast %79 : vector<128xf32> to vector<1x128xf32>
    %c8_i32_56 = arith.constant 8 : i32
    %81 = tpu.dynamic_rotate %80 by %c8_i32_56 dim 1 : vector<1x128xf32>, i32 -> vector<1x128xf32>
    %82 = arith.addf %80, %81 : vector<1x128xf32>
    %c16_i32_57 = arith.constant 16 : i32
    %83 = tpu.dynamic_rotate %82 by %c16_i32_57 dim 1 : vector<1x128xf32>, i32 -> vector<1x128xf32>
    %84 = arith.addf %82, %83 : vector<1x128xf32>
    %c32_i32_58 = arith.constant 32 : i32
    %85 = tpu.dynamic_rotate %84 by %c32_i32_58 dim 1 : vector<1x128xf32>, i32 -> vector<1x128xf32>
    %86 = arith.addf %84, %85 : vector<1x128xf32>
    %c64_i32_59 = arith.constant 64 : i32
    %87 = tpu.dynamic_rotate %86 by %c64_i32_59 dim 1 : vector<1x128xf32>, i32 -> vector<1x128xf32>
    %88 = arith.addf %86, %87 : vector<1x128xf32>
    %cst_60 = arith.constant 0.001953125 : f32
    %89 = vector.broadcast %cst_60 : f32 to vector<1x128xf32>
    %90 = arith.mulf %77, %89 : vector<1x128xf32>
    %cst_61 = arith.constant 0.001953125 : f32
    %91 = vector.broadcast %cst_61 : f32 to vector<1x128xf32>
    %92 = arith.mulf %88, %91 : vector<1x128xf32>
    %93 = arith.mulf %90, %90 : vector<1x128xf32>
    %94 = arith.subf %92, %93 : vector<1x128xf32>
    %cst_62 = arith.constant 0.000000e+00 : f32
    %95 = vector.broadcast %cst_62 : f32 to vector<1x128xf32>
    %96 = arith.maximumf %94, %95 : vector<1x128xf32>
    %c0_63 = arith.constant 0 : index
    %c0_64 = arith.constant 0 : index
    %97 = vector.load %arg6[%c0_63, %c0_64] : memref<1x128xf32, #tpu.memory_space<vmem>>, vector<1x128xf32>
    %cst_65 = arith.constant 9.99999974E-6 : f32
    %98 = vector.broadcast %cst_65 : f32 to vector<1x128xf32>
    %99 = arith.addf %96, %98 : vector<1x128xf32>
    %100 = math.rsqrt %99 : vector<1x128xf32>
    %101 = arith.mulf %97, %100 : vector<1x128xf32>
    %c0_66 = arith.constant 0 : index
    %c0_67 = arith.constant 0 : index
    %102 = vector.load %arg7[%c0_66, %c0_67] : memref<1x128xf32, #tpu.memory_space<vmem>>, vector<1x128xf32>
    %103 = arith.mulf %90, %101 : vector<1x128xf32>
    %104 = arith.subf %102, %103 : vector<1x128xf32>
    %105 = vector.broadcast %101 : vector<1x128xf32> to vector<32x128xf32>
    %106 = arith.mulf %67, %105 : vector<32x128xf32>
    %107 = vector.broadcast %104 : vector<1x128xf32> to vector<32x128xf32>
    %108 = arith.addf %106, %107 : vector<32x128xf32>
    %c0_68 = arith.constant 0 : index
    %c0_69 = arith.constant 0 : index
    %c0_70 = arith.constant 0 : index
    %109 = vector.load %arg1[%c0_68, %c0_69, %c0_70] : memref<2x16x128xf32, #tpu.memory_space<vmem>>, vector<2x16x128xf32>
    %110 = vector.shape_cast %108 : vector<32x128xf32> to vector<2x16x128xf32>
    %111 = arith.addf %109, %110 : vector<2x16x128xf32>
    %cst_71 = arith.constant 0.000000e+00 : f32
    %112 = vector.broadcast %cst_71 : f32 to vector<2x16x128xf32>
    %113 = arith.maximumf %111, %112 : vector<2x16x128xf32>
    %c0_72 = arith.constant 0 : index
    %c0_73 = arith.constant 0 : index
    %c0_74 = arith.constant 0 : index
    %114 = vector.load %arg8[%c0_72, %c0_73, %c0_74] : memref<2x16x128xf32, #tpu.memory_space<vmem>>, vector<2x16x128xf32>
    tpu.vector_store %arg8[%c0_72, %c0_73, %c0_74], %113 {strides = array<i32>} : memref<2x16x128xf32, #tpu.memory_space<vmem>>, vector<2x16x128xf32>,
    return
  }
  func.func @transform_0(%arg0: i32) -> (i32, i32, i32) {
    %c0_i32 = arith.constant 0 : i32
    %c0_i32_0 = arith.constant 0 : i32
    %c0_i32_1 = arith.constant 0 : i32
    %c0_i32_2 = arith.constant 0 : i32
    return %c0_i32, %c0_i32_0, %c0_i32_1 : i32, i32, i32
  }
  func.func @transform_1(%arg0: i32) -> (i32, i32) {
    %c0_i32 = arith.constant 0 : i32
    %c0_i32_0 = arith.constant 0 : i32
    %c0_i32_1 = arith.constant 0 : i32
    return %c0_i32, %c0_i32_0 : i32, i32
  }
  func.func @transform_2(%arg0: i32) -> (i32, i32) {
    %c0_i32 = arith.constant 0 : i32
    %c0_i32_0 = arith.constant 0 : i32
    %c0_i32_1 = arith.constant 0 : i32
    return %c0_i32, %c0_i32_0 : i32, i32
  }
  func.func @transform_3(%arg0: i32) -> (i32, i32) {
    %c0_i32 = arith.constant 0 : i32
    %c0_i32_0 = arith.constant 0 : i32
    %c0_i32_1 = arith.constant 0 : i32
    return %c0_i32, %c0_i32_0 : i32, i32
  }
  func.func @transform_4(%arg0: i32) -> (i32, i32) {
    %c0_i32 = arith.constant 0 : i32
    %c0_i32_0 = arith.constant 0 : i32
    %c0_i32_1 = arith.constant 0 : i32
    return %c0_i32, %c0_i32_0 : i32, i32
  }
  func.func @transform_5(%arg0: i32) -> (i32, i32) {
    %c0_i32 = arith.constant 0 : i32
    %c0_i32_0 = arith.constant 0 : i32
    %c0_i32_1 = arith.constant 0 : i32
    return %c0_i32, %c0_i32_0 : i32, i32
  }
  func.func @transform_6(%arg0: i32) -> (i32, i32) {
    %c0_i32 = arith.constant 0 : i32
    %c0_i32_0 = arith.constant 0 : i32
    %c0_i32_1 = arith.constant 0 : i32
    return %c0_i32, %c0_i32_0 : i32, i32
  }
  func.func @transform_7(%arg0: i32) -> (i32, i32, i32) {
    %c0_i32 = arith.constant 0 : i32
    %c0_i32_0 = arith.constant 0 : i32
    %c0_i32_1 = arith.constant 0 : i32
    %c0_i32_2 = arith.constant 0 : i32
    return %c0_i32, %c0_i32_0, %c0_i32_1 : i32, i32, i32
  }
}

</mosaic_0001>

<bundles_post_ra>
// kernel: tpu_custom_call.1
= control target key start
LH: loop header
LB: loop body
LE: loop exit
PB: predicated region body
PF: predicated region fallthrough
CT: control target
= control target key end

     0   :  { %12 = vsyncpa [#allocation4], 0  ;;  %s1399_s0 = inlined_call_operand.hbm [shape: f32[2,16,128], index: 0, kind: input, shape index: {}]   ;;  %s1400_s1 = inlined_call_operand.hbm [shape: f32[384,128], index: 1, kind: input, shape index: {}]   ;;  %s1401_s2 = inlined_call_operand.vmem [shape: f32[1,128], index: 2, kind: input, shape index: {}]   ;;  %s1402_s3 = inlined_call_operand.vmem [shape: f32[1,128], index: 3, kind: input, shape index: {}]   ;;  %s1403_s4 = inlined_call_operand.hbm [shape: f32[384,128], index: 4, kind: input, shape index: {}]   ;;  %s1404_s5 = inlined_call_operand.vmem [shape: f32[1,128], index: 5, kind: input, shape index: {}]   ;;  %s1405_s6 = inlined_call_operand.vmem [shape: f32[1,128], index: 6, kind: input, shape index: {}]   ;;  %s1406_s7 = inlined_call_operand.hbm [shape: f32[2,16,128], index: 7, kind: output, shape index: {}]  }
   0x1   :  { %13 = vsyncpa [#allocation7], 0 }
   0x2   :  { %14 = vsyncpa [#allocation5], 0  ;;  %s1178_s24 = smov [#allocation6]   ;;  %s1179_s26 = smov [#allocation3]  }
   0x3   :  { %s32_s25 = sshll.u32 %s1178_s24, 4  ;;  %s20_s27 = sshll.u32 %s1179_s26, 4  ;;  %s33_s25 = int_to_ptr.vmem [resolvable:$true] %s32_s25  ;;  %s1228_s27 = int_to_ptr.vmem [resolvable:$true] %s20_s27 }
   0x4   :  { %s1084_s30 = scalar_lea.hbm %s1400_s1, 6144 }
   0x5   :  { %p1085_p0 = scmp.ne.s32.totalorder %s1400_s1, %s1084_s30  ;;  %p1088_p1 = scmp.lt.u32.totalorder %s1084_s30, %s1400_s1 }
   0x7   :  { %p1090_p2 = pnand %p1088_p1, %p1085_p0 }
   0x9   :  { %1093 = shalt.err (!%p1090_p2)
}
   0xa   :  { %s1094_s12 = scalar_lea.vmem %s33_s25, 6144  ;;  %p1099_p4 = scmp.lt.s32.totalorder %s33_s25, %s33_s25 }
   0xb   :  { %p1095_p3 = scmp.ne.s32.totalorder %s33_s25, %s1094_s12  ;;  %p1100_p5 = scmp.lt.s32.totalorder %s1094_s12, %s1094_s12 }
   0xd   :  { %p1101_p6 = por %p1100_p5, %p1099_p4 }
   0xf   :  { %p1102_p7 = pnand %p1101_p6, %p1095_p3 }
  0x11   :  { %1105 = shalt.err (!%p1102_p7)
}
  0x12   :  { %s1180_s13 = smov 128   ;;  %s1181_s14 = smov 8  }
  0x13   :  { %38 = dma.hbm_to_vmem [thread:$0]  %s1400_s1, 6144, %s33_s25, [#allocation7], %s1180_s13, %s1180_s13, %s1181_s14  }
  0x14   :  { %s1106_s19 = scalar_lea.hbm %s1399_s0, 512 }
  0x15   :  { %p1107_p8 = scmp.ne.s32.totalorder %s1399_s0, %s1106_s19  ;;  %p1110_p9 = scmp.lt.u32.totalorder %s1106_s19, %s1399_s0 }
  0x17   :  { %p1112_p10 = pnand %p1110_p9, %p1107_p8 }
  0x19   :  { %1115 = shalt.err (!%p1112_p10)
}
  0x1a   :  { %s1116_s24 = scalar_lea.vmem %s1228_s27, 512  ;;  %p1121_p12 = scmp.lt.s32.totalorder %s1228_s27, %s1228_s27 }
  0x1b   :  { %p1117_p11 = scmp.ne.s32.totalorder %s1228_s27, %s1116_s24  ;;  %p1122_p13 = scmp.lt.s32.totalorder %s1116_s24, %s1116_s24 }
  0x1d   :  { %p1123_p0 = por %p1122_p13, %p1121_p12 }
  0x1f   :  { %p1124_p1 = pnand %p1123_p0, %p1117_p11 }
  0x21   :  { %1127 = shalt.err (!%p1124_p1)
}
  0x22   :  { %26 = dma.hbm_to_vmem [thread:$0]  %s1399_s0, 512, %s1228_s27, [#allocation4], %s1180_s13, %s1180_s13, %s1181_s14  }
  0x23   :  { %s1182_s26 = smov [#allocation8]   ;;  %s1128_s8 = scalar_lea.hbm %s1403_s4, 6144 }
  0x24   :  { %s48_s28 = sshll.u32 %s1182_s26, 4  ;;  %p1129_p2 = scmp.ne.s32.totalorder %s1403_s4, %s1128_s8  ;;  %s49_s28 = int_to_ptr.vmem [resolvable:$true] %s48_s28 }
  0x25   :  { %p1132_p3 = scmp.lt.u32.totalorder %s1128_s8, %s1403_s4 }
  0x27   :  { %p1134_p4 = pnand %p1132_p3, %p1129_p2 }
  0x29   :  { %1137 = shalt.err (!%p1134_p4)
}
  0x2a   :  { %s1138_s15 = scalar_lea.vmem %s49_s28, 6144  ;;  %p1143_p6 = scmp.lt.s32.totalorder %s49_s28, %s49_s28 }
  0x2b   :  { %p1139_p5 = scmp.ne.s32.totalorder %s49_s28, %s1138_s15  ;;  %p1144_p7 = scmp.lt.s32.totalorder %s1138_s15, %s1138_s15 }
  0x2d   :  { %p1145_p8 = por %p1144_p7, %p1143_p6 }
  0x2f   :  { %p1146_p9 = pnand %p1145_p8, %p1139_p5 }
  0x31   :  { %1149 = shalt.err (!%p1146_p9)
}
  0x32   :  { %54 = dma.hbm_to_vmem [thread:$0]  %s1403_s4, 6144, %s49_s28, [#allocation7], %s1180_s13, %s1180_s13, %s1181_s14  }
  0x33   :  { %1172 = dma.done.wait [#allocation4], 512  }
  0x34   :  { %1173 = vsyncadd [#allocation4], 4294966784 }
  0x35   :  { %1174 = dma.done.wait [#allocation7], 12288  }
  0x36   :  { %1175 = vsyncadd [#allocation7], 4294955008  ;;  %v1183_v0 = vmov 0.0   ;;  %v108_v1 = vld [vmem:[#allocation6 + $0x80] sm:$0xff]  ;;  %v109_v2 = vld [vmem:[#allocation6 + $0x88] sm:$0xff]  ;;  %s1184_s4 = smov 16  }
  0x37   :  { %68 = vst [vmem:[#allocation2] sm:$0x1] %v1183_v0  ;;  %69 = vst [vmem:[#allocation2 + $0x18] sm:$0x1] %v1183_v0  ;;  %v92_v3 = vld [vmem:[#allocation6] sm:$0xff]  ;;  %v942_v4 = vpack.c.bf16 %v109_v2, %v108_v1  ;;  %v93_v5 = vld [vmem:[#allocation6 + $0x8] sm:$0xff] }
  0x38   :  { %70 = vst [vmem:[#allocation2 + $0x11] sm:$0x1] %v1183_v0  ;;  %71 = vst [vmem:[#allocation2 + $0x29] sm:$0x1] %v1183_v0  ;;  %v124_v6 = vld [vmem:[#allocation6 + $0x100] sm:$0xff]  ;;  %v125_v7 = vld [vmem:[#allocation6 + $0x108] sm:$0xff]  ;;  %v944_v8 = vpack.c.bf16 %v93_v5, %v92_v3 }
  0x39   :  { %v974_v9 = vpack.c.bf16 %v125_v7, %v124_v6  ;;  %v110_v10 = vld [vmem:[#allocation6 + $0x90] sm:$0xff]  ;;  %v111_v11 = vld [vmem:[#allocation6 + $0x98] sm:$0xff]  ;;  %943 = vmatprep.subr.bf16.mxu0 %v942_v4  ;;  %v112_v19 = vld [vmem:[#allocation6 + $0xa0] sm:$0xff]  ;;  %s1185_s16 = smov 32   ;;  %s1186_s17 = smov 64  }
  0x3a   :  { %v94_v12 = vld [vmem:[#allocation6 + $0x10] sm:$0xff]  ;;  %v946_v13 = vpack.c.bf16 %v111_v11, %v110_v10  ;;  %v95_v14 = vld [vmem:[#allocation6 + $0x18] sm:$0xff]  ;;  %945 = vmatpush3.bf16.msra.mxu0 %v944_v8  ;;  %v113_v20 = vld [vmem:[#allocation6 + $0xa8] sm:$0xff] }
  0x3b   :  { %v126_v15 = vld [vmem:[#allocation6 + $0x110] sm:$0xff]  ;;  %v127_v16 = vld [vmem:[#allocation6 + $0x118] sm:$0xff]  ;;  %975 = vmatprep.subr.bf16.mxu1 %v974_v9  ;;  %v948_v17 = vpack.c.bf16 %v95_v14, %v94_v12  ;;  %v96_v21 = vld [vmem:[#allocation6 + $0x20] sm:$0xff]  ;;  %v950_v22 = vpack.c.bf16 %v113_v20, %v112_v19 }
  0x3c   :  { %v978_v18 = vpack.c.bf16 %v127_v16, %v126_v15  ;;  %977 = vmatpush3.bf16.msra.mxu1 %v974_v9  ;;  %947 = vmatprep.subr.bf16.mxu0 %v946_v13  ;;  %v97_v23 = vld [vmem:[#allocation6 + $0x28] sm:$0xff]  ;;  %v128_v24 = vld [vmem:[#allocation6 + $0x120] sm:$0xff]  ;;  %v114_v27 = vld [vmem:[#allocation6 + $0xb0] sm:$0xff] }
  0x3d   :  { %v129_v25 = vld [vmem:[#allocation6 + $0x128] sm:$0xff]  ;;  %v115_v28 = vld [vmem:[#allocation6 + $0xb8] sm:$0xff]  ;;  %v130_v29 = vld [vmem:[#allocation6 + $0x130] sm:$0xff]  ;;  %v952_v31 = vpack.c.bf16 %v97_v23, %v96_v21 }
  0x3e   :  { %979 = vmatprep.subr.bf16.mxu1 %v978_v18  ;;  %v982_v26 = vpack.c.bf16 %v129_v25, %v128_v24  ;;  %v131_v30 = vld [vmem:[#allocation6 + $0x138] sm:$0xff]  ;;  %949 = vmatpush3.bf16.msra.mxu0 %v948_v17  ;;  %v954_v32 = vpack.c.bf16 %v115_v28, %v114_v27  ;;  %v98_v33 = vld [vmem:[#allocation6 + $0x30] sm:$0xff]  ;;  %v116_v36 = vld [vmem:[#allocation6 + $0xc0] sm:$0xff] }
  0x3f   :  { %951 = vmatprep.subr.bf16.mxu0 %v950_v22  ;;  %v99_v34 = vld [vmem:[#allocation6 + $0x38] sm:$0xff]  ;;  %v986_v35 = vpack.c.bf16 %v131_v30, %v130_v29  ;;  %v117_v37 = vld [vmem:[#allocation6 + $0xc8] sm:$0xff]  ;;  %v132_v38 = vld [vmem:[#allocation6 + $0x140] sm:$0xff] }
  0x40   :  { %981 = vmatpush3.bf16.msra.mxu1 %v978_v18  ;;  %v133_v39 = vld [vmem:[#allocation6 + $0x148] sm:$0xff]  ;;  %v956_v40 = vpack.c.bf16 %v99_v34, %v98_v33  ;;  %v958_v41 = vpack.c.bf16 %v117_v37, %v116_v36  ;;  %v100_v42 = vld [vmem:[#allocation6 + $0x40] sm:$0xff]  ;;  %v118_v45 = vld [vmem:[#allocation6 + $0xd0] sm:$0xff] }
  0x41   :  { %983 = vmatprep.subr.bf16.mxu1 %v982_v26  ;;  %v101_v43 = vld [vmem:[#allocation6 + $0x48] sm:$0xff]  ;;  %v990_v44 = vpack.c.bf16 %v133_v39, %v132_v38  ;;  %v119_v46 = vld [vmem:[#allocation6 + $0xd8] sm:$0xff]  ;;  %v134_v47 = vld [vmem:[#allocation6 + $0x150] sm:$0xff] }
  0x42   :  { %953 = vmatpush3.bf16.msra.mxu0 %v952_v31  ;;  %v135_v48 = vld [vmem:[#allocation6 + $0x158] sm:$0xff]  ;;  %v960_v49 = vpack.c.bf16 %v101_v43, %v100_v42  ;;  %v1280_v50 = vld [vmem:[#allocation3] sm:$0xff]  ;;  %v1282_v51 = vld [vmem:[#allocation3 + $0x8] sm:$0xff]  ;;  %v962_v53 = vpack.c.bf16 %v119_v46, %v118_v45 }
  0x43   :  { %955 = vmatprep.subr.bf16.mxu0 %v954_v32  ;;  %v1284_v52 = vld [vmem:[#allocation3 + $0x10] sm:$0xff]  ;;  %v103_v55 = vld [vmem:[#allocation6 + $0x58] sm:$0xff]  ;;  %76 = vst [vmem:[#allocation2 + $0x1] sm:$0xff] %v1280_v50  ;;  %77 = vst [vmem:[#allocation2 + $0x9] sm:$0xff] %v1282_v51  ;;  %v994_v57 = vpack.c.bf16 %v135_v48, %v134_v47  ;;  %204 = vmatprep.mubr.f32.mxu0 %v1280_v50 }
  0x44   :  { %985 = vmatpush3.bf16.msra.mxu1 %v982_v26  ;;  %v102_v54 = vld [vmem:[#allocation6 + $0x50] sm:$0xff]  ;;  %78 = vst [vmem:[#allocation2 + $0x19] sm:$0xff] %v1284_v52  ;;  %v1289_v56 = vld [vmem:[#allocation3 + $0x18] sm:$0xff]  ;;  %v120_v58 = vld [vmem:[#allocation6 + $0xe0] sm:$0xff] }
  0x45   :  { %987 = vmatprep.subr.bf16.mxu1 %v986_v35  ;;  %v121_v59 = vld [vmem:[#allocation6 + $0xe8] sm:$0xff]  ;;  %79 = vst [vmem:[#allocation2 + $0x21] sm:$0xff] %v1289_v56  ;;  %v136_v60 = vld [vmem:[#allocation6 + $0x160] sm:$0xff]  ;;  %v964_v62 = vpack.c.bf16 %v103_v55, %v102_v54  ;;  %v122_v3 = vld [vmem:[#allocation6 + $0xf0] sm:$0xff] }
  0x46   :  { %957 = vmatpush3.bf16.msra.mxu0 %v956_v40  ;;  %v137_v61 = vld [vmem:[#allocation6 + $0x168] sm:$0xff]  ;;  %v966_v63 = vpack.c.bf16 %v121_v59, %v120_v58  ;;  %v104_v0 = vld [vmem:[#allocation6 + $0x60] sm:$0xff]  ;;  %v123_v4 = vld [vmem:[#allocation6 + $0xf8] sm:$0xff] }
  0x47   :  { %959 = vmatprep.subr.bf16.mxu0 %v958_v41  ;;  %v105_v1 = vld [vmem:[#allocation6 + $0x68] sm:$0xff]  ;;  %v998_v2 = vpack.c.bf16 %v137_v61, %v136_v60  ;;  %v138_v5 = vld [vmem:[#allocation6 + $0x170] sm:$0xff]  ;;  %v139_v6 = vld [vmem:[#allocation6 + $0x178] sm:$0xff]  ;;  %v970_v9 = vpack.c.bf16 %v123_v4, %v122_v3 }
  0x48   :  { %989 = vmatpush3.bf16.msra.mxu1 %v986_v35  ;;  %v968_v7 = vpack.c.bf16 %v105_v1, %v104_v0  ;;  %v106_v10 = vld [vmem:[#allocation6 + $0x70] sm:$0xff]  ;;  %v107_v11 = vld [vmem:[#allocation6 + $0x78] sm:$0xff]  ;;  %v1002_v12 = vpack.c.bf16 %v139_v6, %v138_v5 }
  0x49   :  { %991 = vmatprep.subr.bf16.mxu1 %v990_v44  ;;  %v972_v13 = vpack.c.bf16 %v107_v11, %v106_v10 }
  0x4a   :  { %961 = vmatpush3.bf16.msra.mxu0 %v960_v49  ;;  %v88_v8 = vld [vmem:[#allocation2 + $0x2] sm:$0xff]  ;;  %v89_v15 = vld [vmem:[#allocation2 + $0xa] sm:$0xff] }
  0x4b   :  { %963 = vmatprep.subr.bf16.mxu0 %v962_v53  ;;  %898 = vmatprep.mubr.f32.mxu1 %v88_v8  ;;  %v80_v14 = vld [vmem:[#allocation2] sm:$0xff]  ;;  %v81_v17 = vld [vmem:[#allocation2 + $0x8] sm:$0xff]  ;;  %v82_v19 = vld [vmem:[#allocation2 + $0x18] sm:$0xff] }
  0x4c   :  { %993 = vmatpush3.bf16.msra.mxu1 %v990_v44  ;;  %v90_v16 = vld [vmem:[#allocation2 + $0x1a] sm:$0xff]  ;;  %v91_v18 = vld [vmem:[#allocation2 + $0x22] sm:$0xff] }
  0x4d   :  { %995 = vmatprep.subr.bf16.mxu1 %v994_v57  ;;  %v83_v20 = vld [vmem:[#allocation2 + $0x20] sm:$0xff] }
  0x4e   :  { %965 = vmatpush3.bf16.msra.mxu0 %v964_v62 }
  0x4f   :  { %967 = vmatprep.subr.bf16.mxu0 %v966_v63 }
  0x50   :  { %997 = vmatpush3.bf16.msra.mxu1 %v994_v57 }
  0x51   :  { %999 = vmatprep.subr.bf16.mxu1 %v998_v2 }
  0x52   :  { %969 = vmatpush3.bf16.msra.mxu0 %v968_v7 }
  0x53   :  { %971 = vmatprep.subr.bf16.mxu0 %v970_v9 }
  0x54   :  { %1001 = vmatpush3.bf16.msra.mxu1 %v998_v2 }
  0x55   :  { %1003 = vmatprep.subr.bf16.mxu1 %v1002_v12 }
  0x56   :  { %973 = vmatpush3.bf16.msra.mxu0 %v972_v13  ;;  %v424_v13 = vld [vmem:[#allocation8 + $0x80] sm:$0xff] }
  0x58   :  { %1005 = vmatpush3.bf16.msra.mxu1 %v1002_v12 }
  0x59   :  { %205 = vmatmul.mubr.f32.vlgmr.msra.gmra.mrb[0].mxu0 %v80_v14  ;;  %v425_v14 = vld [vmem:[#allocation8 + $0x88] sm:$0xff] }
  0x5a   :  { %209 = vmatprep.mubr.f32.mxu0 %v1282_v51 }
  0x5b   :  { %899 = vmatmul.mubr.f32.vlgmr.msra.gmra.mrb[0].mxu1 %v89_v15  ;;  %v1006_v15 = vpack.c.bf16 %v425_v14, %v424_v13  ;;  %v436_v14 = vld [vmem:[#allocation8 + $0xe0] sm:$0xff] }
  0x5c   :  { %901 = vmatprep.mubr.f32.mxu1 %v90_v16  ;;  %v440_v16 = vld [vmem:[#allocation8 + $0x100] sm:$0xff] }
  0x5d   :  { %210 = vmatmul.mubr.f32.gmra.mrb[2].mxu0 %v81_v17  ;;  %v441_v17 = vld [vmem:[#allocation8 + $0x108] sm:$0xff]  ;;  %1007 = vmatprep.subr.bf16.mxu0 %v1006_v15 }
  0x5e   :  { %214 = vmatprep.mubr.f32.mxu0 %v1284_v52  ;;  %v437_v15 = vld [vmem:[#allocation8 + $0xe8] sm:$0xff] }
  0x5f   :  { %902 = vmatmul.mubr.f32.gmra.mrb[2].mxu1 %v91_v18  ;;  %v408_v18 = vld [vmem:[#allocation8] sm:$0xff] }
  0x61   :  { %215 = vmatmul.mubr.f32.gmra.mrb[4].mxu0 %v82_v19  ;;  %v1038_v19 = vpack.c.bf16 %v441_v17, %v440_v16  ;;  %v1030_v16 = vpack.c.bf16 %v437_v15, %v436_v14  ;;  %v452_v17 = vld [vmem:[#allocation8 + $0x160] sm:$0xff] }
  0x62   :  { %219 = vmatprep.mubr.f32.mxu0 %v1289_v56 }
  0x63   :  { %1039 = vmatprep.subr.bf16.mxu1 %v1038_v19 }
  0x64   :  { %1041 = vmatpush3.bf16.msra.mxu1 %v1038_v19  ;;  %v420_v19 = vld [vmem:[#allocation8 + $0x60] sm:$0xff] }
  0x65   :  { %220 = vmatmul.mubr.f32.gmra.mrb[6].mxu0 %v83_v20  ;;  %v409_v20 = vld [vmem:[#allocation8 + $0x8] sm:$0xff] }
 0x12c   :  { %v770_v21 = vpop.f32.mrb[0].mxu0 }
 0x12d   :  { %v771_v22 = vpop.f32.mrb[1].mxu0 }
 0x12e   :  { %v900_v23 = vpop.f32.mrb[0].mxu1  ;;  %v772_v24 = vadd.f32 %v771_v22, %v770_v21  ;;  %v1008_v22 = vpack.c.bf16 %v409_v20, %v408_v18  ;;  %v453_v18 = vld [vmem:[#allocation8 + $0x168] sm:$0xff] }
 0x12f   :  { %v291_v25 = vpop.f32.mrb[1].mxu1  ;;  %v1062_v20 = vpack.c.bf16 %v453_v18, %v452_v17 }
 0x130   :  { %v1296_v26 = vadd.f32 %v772_v24, %v291_v25  ;;  %v773_v27 = vpop.f32.mrb[2].mxu0  ;;  %v426_v24 = vld [vmem:[#allocation8 + $0x90] sm:$0xff]  ;;  %v427_v25 = vld [vmem:[#allocation8 + $0x98] sm:$0xff]  ;;  %1009 = vmatpush3.bf16.msra.mxu0 %v1008_v22 }
 0x131   :  { %v774_v28 = vpop.f32.mrb[3].mxu0  ;;  %v438_v22 = vld [vmem:[#allocation8 + $0xf0] sm:$0xff] }
 0x132   :  { %v903_v29 = vpop.f32.mrb[2].mxu1  ;;  %v775_v30 = vadd.f32 %v774_v28, %v773_v27  ;;  %v331_v40 = vmul.f32 %v1296_v26, %v1296_v26  ;;  %v1010_v27 = vpack.c.bf16 %v427_v25, %v426_v24  ;;  %v442_v28 = vld [vmem:[#allocation8 + $0x110] sm:$0xff]  ;;  %v439_v24 = vld [vmem:[#allocation8 + $0xf8] sm:$0xff] }
 0x133   :  { %v301_v31 = vpop.f32.mrb[3].mxu1 }
 0x134   :  { %v1298_v32 = vadd.f32 %v900_v23, %v775_v30  ;;  %v776_v33 = vpop.f32.mrb[4].mxu0  ;;  %v410_v30 = vld [vmem:[#allocation8 + $0x10] sm:$0xff]  ;;  %1011 = vmatprep.subr.bf16.mxu0 %v1010_v27  ;;  %v1034_v27 = vpack.c.bf16 %v439_v24, %v438_v22 }
 0x135   :  { %v777_v34 = vpop.f32.mrb[5].mxu0 }
 0x136   :  { %v778_v35 = vadd.f32 %v777_v34, %v776_v33  ;;  %v332_v36 = vmul.f32 %v1298_v32, %v1298_v32  ;;  %v310_v41 = vadd.f32 %v1298_v32, %v1296_v26  ;;  %v411_v33 = vld [vmem:[#allocation8 + $0x18] sm:$0xff] }
 0x137   :  { %v1012_v34 = vpack.c.bf16 %v411_v33, %v410_v30  ;;  %v422_v30 = vld [vmem:[#allocation8 + $0x70] sm:$0xff]  ;;  %v423_v33 = vld [vmem:[#allocation8 + $0x78] sm:$0xff] }
 0x138   :  { %v1302_v37 = vadd.f32 %v778_v35, %v301_v31  ;;  %v779_v38 = vpop.f32.mrb[6].mxu0  ;;  %v335_v45 = vadd.f32 %v332_v36, %v331_v40  ;;  %v428_v35 = vld [vmem:[#allocation8 + $0xa0] sm:$0xff]  ;;  %v429_v36 = vld [vmem:[#allocation8 + $0xa8] sm:$0xff] }
 0x139   :  { %v780_v39 = vpop.f32.mrb[7].mxu0  ;;  %1013 = vmatpush3.bf16.msra.mxu0 %v1012_v34  ;;  %v445_v40 = vld [vmem:[#allocation8 + $0x128] sm:$0xff]  ;;  %v1036_v34 = vpack.c.bf16 %v423_v33, %v422_v30 }
 0x13a   :  { %v333_v42 = vmul.f32 %v1302_v37, %v1302_v37  ;;  %v781_v43 = vadd.f32 %v780_v39, %v779_v38  ;;  %v311_v44 = vadd.f32 %v310_v41, %v1302_v37  ;;  %v1014_v38 = vpack.c.bf16 %v429_v36, %v428_v35  ;;  %v444_v39 = vld [vmem:[#allocation8 + $0x120] sm:$0xff] }
 0x13b   :  { %v412_v41 = vld [vmem:[#allocation8 + $0x20] sm:$0xff] }
 0x13c   :  { %v1311_v46 = vadd.f32 %v903_v29, %v781_v43  ;;  %v336_v47 = vadd.f32 %v335_v45, %v333_v42  ;;  %v443_v29 = vld [vmem:[#allocation8 + $0x118] sm:$0xff]  ;;  %v1046_v42 = vpack.c.bf16 %v445_v40, %v444_v39  ;;  %v413_v43 = vld [vmem:[#allocation8 + $0x28] sm:$0xff]  ;;  %1015 = vmatprep.subr.bf16.mxu0 %v1014_v38  ;;  %v430_v45 = vld [vmem:[#allocation8 + $0xb0] sm:$0xff] }
 0x13d   :  { %v1042_v31 = vpack.c.bf16 %v443_v29, %v442_v28  ;;  %v454_v28 = vld [vmem:[#allocation8 + $0x170] sm:$0xff]  ;;  %v455_v29 = vld [vmem:[#allocation8 + $0x178] sm:$0xff] }
 0x13e   :  { %v312_v48 = vadd.f32 %v311_v44, %v1311_v46  ;;  %v334_v49 = vmul.f32 %v1311_v46, %v1311_v46  ;;  %v1016_v44 = vpack.c.bf16 %v413_v43, %v412_v41 }
 0x13f   :  { %1043 = vmatprep.subr.bf16.mxu1 %v1042_v31 }
 0x140   :  { %v313_v53 = vrot.slane %v312_v48, 4  ;;  %v337_v54 = vadd.f32 %v336_v47, %v334_v49  ;;  %1045 = vmatpush3.bf16.msra.mxu1 %v1042_v31  ;;  %v431_v47 = vld [vmem:[#allocation8 + $0xb8] sm:$0xff]  ;;  %1017 = vmatpush3.bf16.msra.mxu0 %v1016_v44  ;;  %v446_v49 = vld [vmem:[#allocation8 + $0x130] sm:$0xff]  ;;  %v1066_v31 = vpack.c.bf16 %v455_v29, %v454_v28 }
 0x141   :  { %1047 = vmatprep.subr.bf16.mxu1 %v1046_v42 }
 0x142   :  { %v314_v55 = vadd.f32 %v313_v53, %v312_v48  ;;  %v338_v57 = vrot.slane %v337_v54, 4  ;;  %v1018_v48 = vpack.c.bf16 %v431_v47, %v430_v45  ;;  %v447_v53 = vld [vmem:[#allocation8 + $0x138] sm:$0xff]  ;;  %v369_v47 = vlaneseq }
 0x144   :  { %v315_v58 = vrot.slane %v314_v55, 2  ;;  %v339_v59 = vadd.f32 %v338_v57, %v337_v54  ;;  %1049 = vmatpush3.bf16.msra.mxu1 %v1046_v42  ;;  %v414_v54 = vld [vmem:[#allocation8 + $0x30] sm:$0xff]  ;;  %v415_v57 = vld [vmem:[#allocation8 + $0x38] sm:$0xff]  ;;  %1019 = vmatprep.subr.bf16.mxu0 %v1018_v48  ;;  %v370_v48 = vshrl.u32 %v369_v47, 7 }
 0x146   :  { %v316_v60 = vadd.f32 %v315_v58, %v314_v55  ;;  %v340_v61 = vrot.slane %v339_v59, 2  ;;  %v1050_v55 = vpack.c.bf16 %v447_v53, %v446_v49  ;;  %v1020_v58 = vpack.c.bf16 %v415_v57, %v414_v54  ;;  %v361_v49 = vld [vmem:[%s1401_s2] sm:$0x1] }
 0x147   :  { %v1335_v53 = vsub.s32 0, %v370_v48 }
 0x148   :  { %v317_v62 = vrot.slane %v316_v60, 1  ;;  %v341_v63 = vadd.f32 %v340_v61, %v339_v59  ;;  %1051 = vmatprep.subr.bf16.mxu1 %v1050_v55  ;;  %v432_v59 = vld [vmem:[#allocation8 + $0xc0] sm:$0xff]  ;;  %1021 = vmatpush3.bf16.msra.mxu0 %v1020_v58 }
 0x149   :  { %1053 = vmatpush3.bf16.msra.mxu1 %v1050_v55 }
 0x14a   :  { %v318_v0 = vadd.f32 %v317_v62, %v316_v60  ;;  %v342_v1 = vrot.slane %v341_v63, 1  ;;  %v433_v60 = vld [vmem:[#allocation8 + $0xc8] sm:$0xff]  ;;  %v448_v62 = vld [vmem:[#allocation8 + $0x140] sm:$0xff] }
 0x14b   :  { %v1022_v61 = vpack.c.bf16 %v433_v60, %v432_v59 }
 0x14c   :  { %319 = vrot.lane.b32.xlu0 %v318_v0, %s1181_s14  ;;  %v343_v2 = vadd.f32 %v342_v1, %v341_v63  ;;  %v449_v63 = vld [vmem:[#allocation8 + $0x148] sm:$0xff] }
 0x14d   :  { %v1054_v1 = vpack.c.bf16 %v449_v63, %v448_v62  ;;  %1023 = vmatprep.subr.bf16.mxu0 %v1022_v61 }
 0x14f   :  { %1055 = vmatprep.subr.bf16.mxu1 %v1054_v1 }
 0x150   :  { %344 = vrot.lane.b32.xlu0 %v343_v2, %s1181_s14  ;;  %1057 = vmatpush3.bf16.msra.mxu1 %v1054_v1 }
 0x1be   :  { %v320_v3 = vpop.permute.xlu0 %319 }
 0x1bf   :  { %v321_v4 = vadd.f32 %v320_v3, %v318_v0  ;;  %v416_v0 = vld [vmem:[#allocation8 + $0x40] sm:$0xff] }
 0x1c1   :  { %322 = vrot.lane.b32.xlu1 %v321_v4, %s1184_s4 }
 0x1c2   :  { %v345_v5 = vpop.permute.xlu0 %344 }
 0x1c3   :  { %v346_v6 = vadd.f32 %v345_v5, %v343_v2  ;;  %v417_v2 = vld [vmem:[#allocation8 + $0x48] sm:$0xff]  ;;  %v435_v5 = vld [vmem:[#allocation8 + $0xd8] sm:$0xff] }
 0x1c4   :  { %v1024_v3 = vpack.c.bf16 %v417_v2, %v416_v0 }
 0x1c5   :  { %347 = vrot.lane.b32.xlu1 %v346_v6, %s1184_s4 }
 0x1c6   :  { %1025 = vmatpush3.bf16.msra.mxu0 %v1024_v3 }
 0x233   :  { %v323_v7 = vpop.permute.xlu1 %322 }
 0x234   :  { %v324_v8 = vadd.f32 %v323_v7, %v321_v4  ;;  %v434_v4 = vld [vmem:[#allocation8 + $0xd0] sm:$0xff] }
 0x235   :  { %v450_v7 = vld [vmem:[#allocation8 + $0x150] sm:$0xff] }
 0x236   :  { %325 = vrot.lane.b32.xlu0 %v324_v8, %s1185_s16 }
 0x237   :  { %v348_v9 = vpop.permute.xlu1 %347 }
 0x238   :  { %v349_v10 = vadd.f32 %v348_v9, %v346_v6  ;;  %v1026_v6 = vpack.c.bf16 %v435_v5, %v434_v4  ;;  %v418_v9 = vld [vmem:[#allocation8 + $0x50] sm:$0xff] }
 0x23a   :  { %350 = vrot.lane.b32.xlu1 %v349_v10, %s1185_s16  ;;  %1027 = vmatprep.subr.bf16.mxu0 %v1026_v6 }
 0x2a8   :  { %v326_v11 = vpop.permute.xlu0 %325 }
 0x2a9   :  { %v1322_v12 = vadd.f32 %v326_v11, %v324_v8  ;;  %v451_v8 = vld [vmem:[#allocation8 + $0x158] sm:$0xff] }
 0x2aa   :  { %v419_v11 = vld [vmem:[#allocation8 + $0x58] sm:$0xff] }
 0x2ab   :  { %328 = vrot.lane.b32.xlu0 %v1322_v12, %s1186_s17  ;;  %v1028_v13 = vpack.c.bf16 %v419_v11, %v418_v9 }
 0x2ac   :  { %v351_v21 = vpop.permute.xlu1 %350 }
 0x2ad   :  { %v1326_v23 = vadd.f32 %v351_v21, %v349_v10  ;;  %v1058_v10 = vpack.c.bf16 %v451_v8, %v450_v7  ;;  %1029 = vmatpush3.bf16.msra.mxu0 %v1028_v13  ;;  %v421_v21 = vld [vmem:[#allocation8 + $0x68] sm:$0xff] }
 0x2ae   :  { %1031 = vmatprep.subr.bf16.mxu0 %v1030_v16  ;;  %v1032_v25 = vpack.c.bf16 %v421_v21, %v420_v19 }
 0x2af   :  { %353 = vrot.lane.b32.xlu1 %v1326_v23, %s1186_s17  ;;  %1059 = vmatprep.subr.bf16.mxu1 %v1058_v10 }
 0x2b0   :  { %1061 = vmatpush3.bf16.msra.mxu1 %v1058_v10 }
 0x2b1   :  { %1063 = vmatprep.subr.bf16.mxu1 %v1062_v20  ;;  %1033 = vmatpush3.bf16.msra.mxu0 %v1032_v25 }
 0x2b2   :  { %1035 = vmatprep.subr.bf16.mxu0 %v1034_v27 }
 0x2b4   :  { %1065 = vmatpush3.bf16.msra.mxu1 %v1062_v20 }
 0x2b5   :  { %1067 = vmatprep.subr.bf16.mxu1 %v1066_v31  ;;  %1037 = vmatpush3.bf16.msra.mxu0 %v1036_v34 }
 0x2b8   :  { %1069 = vmatpush3.bf16.msra.mxu1 %v1066_v31 }
 0x31d   :  { %v329_v35 = vpop.permute.xlu0 %328 }
 0x31e   :  { %v330_v36 = vadd.f32 %v329_v35, %v1322_v12 }
 0x320   :  { %v356_v38 = vmul.f32 0.001953125, %v330_v36 }
 0x321   :  { %v354_v39 = vpop.permute.xlu1 %353 }
 0x322   :  { %v355_v40 = vadd.f32 %v354_v39, %v1326_v23  ;;  %v358_v41 = vmul.f32 %v356_v38, %v356_v38  ;;  %v365_v23 = vld [vmem:[%s1402_s3] sm:$0x1] }
 0x324   :  { %v357_v42 = vmul.f32 0.001953125, %v355_v40 }
 0x326   :  { %v359_v43 = vsub.f32 %v357_v42, %v358_v41 }
 0x328   :  { %v360_v44 = vmax.f32 %v359_v43, 0.0 }
 0x32a   :  { %v362_v45 = vadd.f32 1e-05, %v360_v44 }
 0x32c   :  { %1080 = vrsqrt.f32 %v362_v45 }
 0x336   :  { %v1081_v54 = vpop.eup %1080 }
 0x337   :  { %v364_v12 = vmul.f32 %v1081_v54, %v361_v49 }
 0x339   :  { %v366_v55 = vmul.f32 %v364_v12, %v356_v38  ;;  %v372_v57 = vrot.slane %v364_v12, %v1335_v53 }
 0x33b   :  { %v367_v58 = vsub.f32 %v365_v23, %v366_v55  ;;  %v374_v59 = vmul.f32 %v372_v57, %v1296_v26  ;;  %v375_v60 = vmul.f32 %v372_v57, %v1298_v32  ;;  %v376_v61 = vmul.f32 %v372_v57, %v1302_v37 }
 0x33c   :  { %v377_v62 = vmul.f32 %v372_v57, %v1311_v46 }
 0x33d   :  { %v382_v63 = vrot.slane %v367_v58, %v1335_v53 }
 0x33f   :  { %v384_v0 = vadd.f32 %v382_v63, %v374_v59  ;;  %v385_v1 = vadd.f32 %v382_v63, %v375_v60  ;;  %v386_v2 = vadd.f32 %v382_v63, %v376_v61  ;;  %v387_v3 = vadd.f32 %v382_v63, %v377_v62 }
 0x341   :  { %v388_v4 = vmax.f32 %v384_v0, 0.0  ;;  %v389_v5 = vmax.f32 %v385_v1, 0.0  ;;  %v390_v6 = vmax.f32 %v386_v2, 0.0  ;;  %v391_v7 = vmax.f32 %v387_v3, 0.0 }
 0x343   :  { %392 = vst [vmem:[#allocation2 + $0x1] sm:$0xff] %v388_v4  ;;  %393 = vst [vmem:[#allocation2 + $0x9] sm:$0xff] %v389_v5  ;;  %520 = vmatprep.mubr.f32.mxu0 %v388_v4 }
 0x344   :  { %394 = vst [vmem:[#allocation2 + $0x19] sm:$0xff] %v390_v6  ;;  %395 = vst [vmem:[#allocation2 + $0x21] sm:$0xff] %v391_v7 }
 0x34a   :  { %v404_v26 = vld [vmem:[#allocation2 + $0x2] sm:$0xff]  ;;  %v405_v37 = vld [vmem:[#allocation2 + $0xa] sm:$0xff] }
 0x34b   :  { %v396_v32 = vld [vmem:[#allocation2] sm:$0xff]  ;;  %936 = vmatprep.mubr.f32.mxu1 %v404_v26  ;;  %v397_v8 = vld [vmem:[#allocation2 + $0x8] sm:$0xff]  ;;  %v398_v10 = vld [vmem:[#allocation2 + $0x18] sm:$0xff] }
 0x34c   :  { %521 = vmatmul.mubr.f32.vlgmr.msra.gmra.mrb[8].mxu0 %v396_v32  ;;  %937 = vmatmul.mubr.f32.vlgmr.msra.gmra.mrb[4].mxu1 %v405_v37  ;;  %v406_v46 = vld [vmem:[#allocation2 + $0x1a] sm:$0xff]  ;;  %v407_v9 = vld [vmem:[#allocation2 + $0x22] sm:$0xff] }
 0x34d   :  { %525 = vmatprep.mubr.f32.mxu0 %v389_v5  ;;  %939 = vmatprep.mubr.f32.mxu1 %v406_v46  ;;  %v399_v11 = vld [vmem:[#allocation2 + $0x20] sm:$0xff] }
 0x350   :  { %526 = vmatmul.mubr.f32.gmra.mrb[10].mxu0 %v397_v8  ;;  %940 = vmatmul.mubr.f32.gmra.mrb[6].mxu1 %v407_v9 }
 0x351   :  { %530 = vmatprep.mubr.f32.mxu0 %v390_v6 }
 0x354   :  { %531 = vmatmul.mubr.f32.gmra.mrb[12].mxu0 %v398_v10 }
 0x355   :  { %535 = vmatprep.mubr.f32.mxu0 %v391_v7 }
 0x358   :  { %536 = vmatmul.mubr.f32.gmra.mrb[14].mxu0 %v399_v11 }
 0x41f   :  { %v834_v13 = vpop.f32.mrb[8].mxu0  ;;  %v938_v14 = vpop.f32.mrb[4].mxu1 }
 0x420   :  { %v835_v15 = vpop.f32.mrb[9].mxu0  ;;  %v607_v17 = vpop.f32.mrb[5].mxu1 }
 0x421   :  { %v836_v16 = vadd.f32 %v835_v15, %v834_v13 }
 0x423   :  { %v1346_v18 = vadd.f32 %v836_v16, %v607_v17  ;;  %v837_v19 = vpop.f32.mrb[10].mxu0  ;;  %v941_v20 = vpop.f32.mrb[6].mxu1 }
 0x424   :  { %v838_v21 = vpop.f32.mrb[11].mxu0  ;;  %v617_v24 = vpop.f32.mrb[7].mxu1 }
 0x425   :  { %v839_v22 = vadd.f32 %v838_v21, %v837_v19  ;;  %v647_v35 = vmul.f32 %v1346_v18, %v1346_v18  ;;  %v677_v19 = vld [vmem:[%s1404_s5] sm:$0x1]  ;;  %s1187_s5 = smov [#allocation9]  }
 0x426   :  { %s725_s24 = sshll.u32 %s1187_s5, 4  ;;  %s726_s24 = int_to_ptr.vmem [resolvable:$true] %s725_s24 }
 0x427   :  { %v1348_v25 = vadd.f32 %v938_v14, %v839_v22  ;;  %v840_v27 = vpop.f32.mrb[12].mxu0  ;;  %v681_v22 = vld [vmem:[%s1405_s6] sm:$0x1]  ;;  %s1150_s6 = scalar_lea.vmem %s726_s24, 512  ;;  %p1155_p11 = scmp.lt.s32.totalorder %s726_s24, %s726_s24 }
 0x428   :  { %v841_v28 = vpop.f32.mrb[13].mxu0  ;;  %p1151_p10 = scmp.ne.s32.totalorder %s726_s24, %s1150_s6  ;;  %p1156_p12 = scmp.lt.s32.totalorder %s1150_s6, %s1150_s6 }
 0x429   :  { %v842_v29 = vadd.f32 %v841_v28, %v840_v27  ;;  %v648_v30 = vmul.f32 %v1348_v25, %v1348_v25  ;;  %v626_v36 = vadd.f32 %v1348_v25, %v1346_v18 }
 0x42a   :  { %p1157_p13 = por %p1156_p12, %p1155_p11 }
 0x42b   :  { %v1352_v31 = vadd.f32 %v842_v29, %v617_v24  ;;  %v843_v33 = vpop.f32.mrb[14].mxu0  ;;  %v651_v40 = vadd.f32 %v648_v30, %v647_v35 }
 0x42c   :  { %v844_v34 = vpop.f32.mrb[15].mxu0  ;;  %p1158_p0 = pnand %p1157_p13, %p1151_p10 }
 0x42d   :  { %v649_v38 = vmul.f32 %v1352_v31, %v1352_v31  ;;  %v845_v39 = vadd.f32 %v844_v34, %v843_v33  ;;  %v627_v41 = vadd.f32 %v626_v36, %v1352_v31 }
 0x42f   :  { %v623_v42 = vadd.f32 %v941_v20, %v845_v39  ;;  %v652_v43 = vadd.f32 %v651_v40, %v649_v38 }
 0x431   :  { %v628_v44 = vadd.f32 %v627_v41, %v623_v42  ;;  %v650_v45 = vmul.f32 %v623_v42, %v623_v42 }
 0x433   :  { %v629_v47 = vrot.slane %v628_v44, 4  ;;  %v653_v48 = vadd.f32 %v652_v43, %v650_v45 }
 0x435   :  { %v630_v49 = vadd.f32 %v629_v47, %v628_v44  ;;  %v654_v54 = vrot.slane %v653_v48, 4 }
 0x437   :  { %v631_v12 = vrot.slane %v630_v49, 2  ;;  %v655_v23 = vadd.f32 %v654_v54, %v653_v48 }
 0x439   :  { %v632_v55 = vadd.f32 %v631_v12, %v630_v49  ;;  %v656_v57 = vrot.slane %v655_v23, 2 }
 0x43b   :  { %v633_v58 = vrot.slane %v632_v55, 1  ;;  %v657_v59 = vadd.f32 %v656_v57, %v655_v23 }
 0x43d   :  { %v634_v60 = vadd.f32 %v633_v58, %v632_v55  ;;  %v658_v61 = vrot.slane %v657_v59, 1 }
 0x43f   :  { %635 = vrot.lane.b32.xlu0 %v634_v60, %s1181_s14  ;;  %v659_v62 = vadd.f32 %v658_v61, %v657_v59 }
 0x441   :  { %660 = vrot.lane.b32.xlu1 %v659_v62, %s1181_s14 }
 0x4b1   :  { %v636_v63 = vpop.permute.xlu0 %635 }
 0x4b2   :  { %v637_v0 = vadd.f32 %v636_v63, %v634_v60 }
 0x4b3   :  { %v661_v1 = vpop.permute.xlu1 %660 }
 0x4b4   :  { %v662_v2 = vadd.f32 %v661_v1, %v659_v62  ;;  %638 = vrot.lane.b32.xlu0 %v637_v0, %s1184_s4 }
 0x4b6   :  { %663 = vrot.lane.b32.xlu1 %v662_v2, %s1184_s4 }
 0x526   :  { %v639_v3 = vpop.permute.xlu0 %638 }
 0x527   :  { %v640_v4 = vadd.f32 %v639_v3, %v637_v0 }
 0x528   :  { %v664_v5 = vpop.permute.xlu1 %663 }
 0x529   :  { %v665_v6 = vadd.f32 %v664_v5, %v662_v2  ;;  %641 = vrot.lane.b32.xlu0 %v640_v4, %s1185_s16 }
 0x52b   :  { %666 = vrot.lane.b32.xlu1 %v665_v6, %s1185_s16 }
 0x59b   :  { %v642_v7 = vpop.permute.xlu0 %641 }
 0x59c   :  { %v643_v26 = vadd.f32 %v642_v7, %v640_v4 }
 0x59d   :  { %v667_v32 = vpop.permute.xlu1 %666 }
 0x59e   :  { %v668_v37 = vadd.f32 %v667_v32, %v665_v6  ;;  %644 = vrot.lane.b32.xlu0 %v643_v26, %s1186_s17 }
 0x5a0   :  { %669 = vrot.lane.b32.xlu1 %v668_v37, %s1186_s17 }
 0x610   :  { %v645_v46 = vpop.permute.xlu0 %644 }
 0x611   :  { %v646_v8 = vadd.f32 %v645_v46, %v643_v26 }
 0x612   :  { %v670_v9 = vpop.permute.xlu1 %669 }
 0x613   :  { %v672_v10 = vmul.f32 0.001953125, %v646_v8  ;;  %v671_v11 = vadd.f32 %v670_v9, %v668_v37 }
 0x615   :  { %v674_v13 = vmul.f32 %v672_v10, %v672_v10  ;;  %v673_v14 = vmul.f32 0.001953125, %v671_v11 }
 0x617   :  { %v675_v15 = vsub.f32 %v673_v14, %v674_v13 }
 0x619   :  { %v676_v16 = vmax.f32 %v675_v15, 0.0 }
 0x61b   :  { %v678_v17 = vadd.f32 1e-05, %v676_v16 }
 0x61d   :  { %1082 = vrsqrt.f32 %v678_v17 }
 0x627   :  { %v1083_v20 = vpop.eup %1082 }
 0x628   :  { %v680_v21 = vmul.f32 %v1083_v20, %v677_v19 }
 0x62a   :  { %v682_v24 = vmul.f32 %v680_v21, %v672_v10  ;;  %v688_v27 = vrot.slane %v680_v21, %v1335_v53 }
 0x62c   :  { %v683_v28 = vsub.f32 %v681_v22, %v682_v24  ;;  %v690_v29 = vmul.f32 %v688_v27, %v1346_v18  ;;  %v691_v30 = vmul.f32 %v688_v27, %v1348_v25  ;;  %v692_v33 = vmul.f32 %v688_v27, %v1352_v31 }
 0x62d   :  { %v693_v34 = vmul.f32 %v688_v27, %v623_v42 }
 0x62e   :  { %v698_v35 = vrot.slane %v683_v28, %v1335_v53 }
 0x630   :  { %v700_v36 = vadd.f32 %v698_v35, %v690_v29  ;;  %v701_v38 = vadd.f32 %v698_v35, %v691_v30  ;;  %v702_v39 = vadd.f32 %v698_v35, %v692_v33  ;;  %v703_v40 = vadd.f32 %v698_v35, %v693_v34 }
 0x632   :  { %v708_v41 = vadd.f32 %v700_v36, %v1280_v50  ;;  %v709_v43 = vadd.f32 %v701_v38, %v1282_v51  ;;  %v710_v44 = vadd.f32 %v702_v39, %v1284_v52  ;;  %v711_v18 = vadd.f32 %v703_v40, %v1289_v56 }
 0x634   :  { %v712_v25 = vmax.f32 %v708_v41, 0.0  ;;  %v713_v45 = vmax.f32 %v709_v43, 0.0  ;;  %v714_v31 = vmax.f32 %v710_v44, 0.0  ;;  %v715_v42 = vmax.f32 %v711_v18, 0.0 }
 0x636   :  { %716 = vst [vmem:[#allocation9] sm:$0xff] %v712_v25  ;;  %717 = vst [vmem:[#allocation9 + $0x8] sm:$0xff] %v713_v45 }
 0x637   :  { %718 = vst [vmem:[#allocation9 + $0x10] sm:$0xff] %v714_v31  ;;  %719 = vst [vmem:[#allocation9 + $0x18] sm:$0xff] %v715_v42 }
 0x638   :  { %1161 = shalt.err (!%p1158_p0)
}
 0x639   :  { %s1162_s26 = scalar_lea.hbm %s1406_s7, 512 }
 0x63a   :  { %p1163_p1 = scmp.ne.s32.totalorder %s1406_s7, %s1162_s26  ;;  %p1166_p2 = scmp.lt.u32.totalorder %s1162_s26, %s1406_s7 }
 0x63c   :  { %p1168_p3 = pnand %p1166_p2, %p1163_p1 }
 0x63e   :  { %1171 = shalt.err (!%p1168_p3)
}
 0x63f   :  { %731 = dma.vmem_to_hbm [thread:$0]  %s726_s24, 512, %s1406_s7, [#allocation5], %s1180_s13, %s1180_s13, %s1181_s14  }
 0x640   :  { %1176 = dma.done.wait [#allocation5], 512  }
 0x641   :  { %1177 = vsyncadd [#allocation5], 4294966784 }
 0x642   :  { %735 = vsyncpa [#allocation4], 1 }
 0x643   :  { %736 = vsyncpa [#allocation7], 1 }
 0x644   :  { %737 = vsyncpa [#allocation5], 1 }

</bundles_post_ra>
